<compile_context>
chip_gen: v6e
topology: v6e:2x2x1
jax: 0.10.0
libtpu: 0.0.40
codegen_flags: <defaults>
</compile_context>

<pallas_src>
import functools
import math

import jax
import jax.numpy as jnp
from jax import lax
from jax.experimental import pallas as pl
from jax.experimental.pallas import tpu as pltpu


def _flash_mqa_kernel(q_ref, k_ref, v_ref, o_ref, m_scr, l_scr, acc_scr, *,
                      use_bf16_exp):
    """Grid = (batch, q_tile, kv_tile); kv_tile is the ("arbitrary") reduction axis.

    q_ref : (H, tq, D)  pre-scaled queries, head-major, compute dtype
    k_ref : (tk, D)     shared MQA keys for this kv tile
    v_ref : (tk, D)     shared MQA values for this kv tile
    o_ref : (H, tq, D)  per-head attention context (pre-output-projection)
    """
    ki = pl.program_id(2)
    n_heads, tq, d = q_ref.shape

    # ---- init (once per (batch, q_tile)) ----
    @pl.when(ki == 0)
    def _init():
        m_scr[...] = jnp.full(m_scr.shape, -jnp.inf, m_scr.dtype)
        l_scr[...] = jnp.zeros(l_scr.shape, l_scr.dtype)
        acc_scr[...] = jnp.zeros(acc_scr.shape, acc_scr.dtype)

    # ---- scores for ALL heads in one NT MXU matmul: (H*tq, D) x (tk, D)^T ----
    q = q_ref[...].reshape(n_heads * tq, d)          # merge leading dims (layout-free)
    k = k_ref[...]
    v = v_ref[...]
    s = lax.dot_general(q, k, (((1,), (1,)), ((), ())),
                        preferred_element_type=jnp.float32)      # (H*tq, tk) f32

    # RoPE: identity here (all rotation angles are zero, see header comment).
    # TODO(synk): optional attention mask (module's default mask=None path only).

    # ---- online softmax: max/alpha/l bookkeeping in f32; exponentials in bf16
    # on v6e/v7x (EUP is the binding VLIW slot there), f32 on v5e/older. ----
    m_prev = m_scr[...]
    m_new = jnp.maximum(m_prev, jnp.max(s, axis=-1, keepdims=True))
    alpha = jnp.exp(m_prev - m_new)                               # (H*tq, 1) f32
    if use_bf16_exp:
        p = jnp.exp((s - m_new).astype(jnp.bfloat16))             # bf16 EUP stream
    else:
        p = jnp.exp(s - m_new)                                    # f32 EUP stream
    l_scr[...] = alpha * l_scr[...] + jnp.sum(
        p.astype(jnp.float32), axis=-1, keepdims=True)
    acc_scr[...] = alpha * acc_scr[...] + jnp.dot(
        p.astype(v.dtype), v, preferred_element_type=jnp.float32)  # (H*tq, D)
    m_scr[...] = m_new

    # ---- finalize: normalize and emit head-major context ----
    @pl.when(ki == pl.num_programs(2) - 1)
    def _finalize():
        ctx = acc_scr[...] * pl.reciprocal(l_scr[...], approx=True)
        o_ref[...] = ctx.reshape(n_heads, tq, d).astype(o_ref.dtype)


def _use_bf16_exp_default():
    """bf16 exponentials only where the EUP has a bf16 path (v6e / v7x)."""
    try:
        kind = jax.devices()[0].device_kind.lower()
    except Exception:
        return False
    return any(tag in kind for tag in ("v6", "v7", "7x"))


def multi_query_attention(x, params, *, n_heads, block_q=None, block_kv=None,
                          compute_dtype=jnp.bfloat16, use_bf16_exp=None):
    """Pallas multi-query attention forward (mask=None path)."""
    B, S, E = x.shape
    assert E % n_heads == 0, "embedding_size must be divisible by n_q_heads"
    D = E // n_heads
    wq, bq, wk, bk, wv, bv, wo, bo = params

    if block_q is None:
        block_q = min(S, 128)
    if block_kv is None:
        block_kv = min(S, 512)
    assert S % block_q == 0 and S % block_kv == 0
    if use_bf16_exp is None:
        use_bf16_exp = _use_bf16_exp_default()

    scale = 1.0 / math.sqrt(D)

    # ---- prologue (XLA GEMMs, once per sequence): Q/K/V projections. ----
    # K/V are projected ONCE for the whole sequence instead of being recomputed
    # for every query tile inside the kernel (the old scheme roughly doubled
    # MXU work at D=128 and re-DMA'd x (S/block_q)x per batch).
    xc = x.astype(compute_dtype)
    wq_c, wk_c, wv_c, wo_c = (w.astype(compute_dtype) for w in (wq, wk, wv, wo))
    q = (jnp.dot(xc, wq_c, preferred_element_type=jnp.float32) + bq[0]) * scale
    q = q.astype(compute_dtype).reshape(B, S, n_heads, D).transpose(0, 2, 1, 3)  # (B,H,S,D)
    k = (jnp.dot(xc, wk_c, preferred_element_type=jnp.float32) + bk[0]).astype(compute_dtype)
    v = (jnp.dot(xc, wv_c, preferred_element_type=jnp.float32) + bv[0]).astype(compute_dtype)

    # ---- explicit VMEM budget (no resident weights in the kernel). ----
    itemsize = jnp.dtype(compute_dtype).itemsize
    q_tile = n_heads * block_q * D * itemsize
    kv_tile = block_kv * D * itemsize
    o_tile = n_heads * block_q * D * itemsize
    scratch_bytes = n_heads * block_q * (D + 2) * 4
    score_tmp = 3 * n_heads * block_q * block_kv * 4            # s (f32) + p + casts
    budget = 2 * (q_tile + 2 * kv_tile + o_tile) + scratch_bytes + score_tmp
    # 2x headroom; floor at the smallest default scoped limit (16 MiB, v5e),
    # cap at 48 MiB so it still fits v7x's 64 MiB physical VMEM per TensorCore.
    # For very large H*block_q*block_kv, shrink block_kv instead of the cap.
    vmem_limit = int(min(max(2 * budget, 16 * 1024 * 1024), 48 * 1024 * 1024))

    grid = (B, S // block_q, S // block_kv)

    ctx = pl.pallas_call(
        functools.partial(_flash_mqa_kernel, use_bf16_exp=use_bf16_exp),
        out_shape=jax.ShapeDtypeStruct((B, n_heads, S, D), compute_dtype),
        grid=grid,
        in_specs=[
            pl.BlockSpec((pl.Squeezed(), n_heads, block_q, D),
                         lambda b, qi, ki: (b, 0, qi, 0)),      # Q tile, all heads
            pl.BlockSpec((pl.Squeezed(), block_kv, D),
                         lambda b, qi, ki: (b, ki, 0)),         # K tile (shared, MQA)
            pl.BlockSpec((pl.Squeezed(), block_kv, D),
                         lambda b, qi, ki: (b, ki, 0)),         # V tile (shared, MQA)
        ],
        out_specs=pl.BlockSpec((pl.Squeezed(), n_heads, block_q, D),
                               lambda b, qi, ki: (b, 0, qi, 0)),
        scratch_shapes=[
            pltpu.VMEM((n_heads * block_q, 1), jnp.float32),    # running max m
            pltpu.VMEM((n_heads * block_q, 1), jnp.float32),    # running denom l
            pltpu.VMEM((n_heads * block_q, D), jnp.float32),    # running numerator
        ],
        compiler_params=pltpu.CompilerParams(
            # batch & query tiles parallel (shards across v7x's 2 TensorCores);
            # the KV axis is the online-softmax reduction.
            dimension_semantics=("parallel", "parallel", "arbitrary"),
            vmem_limit_bytes=vmem_limit,
        ),
    )(q, k, v)

    # ---- epilogue (XLA GEMM): output projection as ONE lane-dense
    # (B*S, E)@(E, E) matmul; Wo never occupies kernel VMEM (v7x-safe). ----
    ctx = ctx.transpose(0, 2, 1, 3).reshape(B, S, E)
    out = jnp.dot(ctx, wo_c, preferred_element_type=jnp.float32) + bo[0]
    return out.astype(x.dtype)


def reference(x, params, *, n_heads):
    """Pure-JAX f32 reference mirroring the PyTorch forward (mask=None)."""
    wq, bq, wk, bk, wv, bv, wo, bo = params
    E = x.shape[-1]
    D = E // n_heads
    q = x @ wq + bq[0]
    k = x @ wk + bk[0]
    v = x @ wv + bv[0]
    outs = []
    for h in range(n_heads):
        qh = q[..., h * D:(h + 1) * D]
        s = jnp.einsum("bsd,btd->bst", qh, k) / math.sqrt(D)
        p = jax.nn.softmax(s, axis=-1)
        outs.append(jnp.einsum("bst,btd->bsd", p, v))
    ctx = jnp.concatenate(outs, axis=-1)
    return ctx @ wo + bo[0]


def init_params(key, embedding_size, n_heads, dtype=jnp.float32):
    """Deterministic synthetic parameters (config.bias assumed True)."""
    D = embedding_size // n_heads
    ks = jax.random.split(key, 8)
    scale = 0.02
    # Per-head q_proj weights concatenated along the output dim -> (E, H*D) = (E, E)
    wq = scale * jax.random.normal(ks[0], (embedding_size, n_heads * D), dtype)
    bq = scale * jax.random.normal(ks[1], (1, n_heads * D), dtype)
    wk = scale * jax.random.normal(ks[2], (embedding_size, D), dtype)
    bk = scale * jax.random.normal(ks[3], (1, D), dtype)
    wv = scale * jax.random.normal(ks[4], (embedding_size, D), dtype)
    bv = scale * jax.random.normal(ks[5], (1, D), dtype)
    wo = scale * jax.random.normal(ks[6], (embedding_size, embedding_size), dtype)
    bo = scale * jax.random.normal(ks[7], (1, embedding_size), dtype)
    return (wq, bq, wk, bk, wv, bv, wo, bo)


if __name__ == "__main__":
    B, S, E, H = 2, 16, 32, 4   # batch, seq, embedding_size, n_q_heads (head_dim = 8)

    key = jax.random.PRNGKey(0)
    kx, kp = jax.random.split(key)
    x = jax.random.normal(kx, (B, S, E), jnp.float32)
    params = init_params(kp, E, H)

    # Small tiles so the online-softmax reduction runs over multiple kv steps
    # and multiple parallel query tiles are exercised.
    out = multi_query_attention(x, params, n_heads=H, block_q=8, block_kv=8)
    out = jax.block_until_ready(out)

    ref = reference(x, params, n_heads=H)
    assert out.shape == (B, S, E)
    max_err = jnp.max(jnp.abs(out - ref))
    # bf16 compute + approx reciprocal (+ bf16 exp on v6e/v7x) => loosened
    # tolerance vs the f32 reference.
    assert jnp.allclose(out, ref, atol=2e-3, rtol=2e-2), (
        "mismatch vs reference, max abs err = %s" % max_err)

    print("KERNEL_OK")
</pallas_src>

<mosaic_0001>
module attributes {stable_mosaic.version = 11 : i64} {
  func.func @_flash_mqa_kernel(%arg0: i32, %arg1: i32, %arg2: i32, %arg3: memref<1x4x8x8xbf16, #tpu.memory_space<vmem>>, %arg4: memref<1x8x8xbf16, #tpu.memory_space<vmem>>, %arg5: memref<1x8x8xbf16, #tpu.memory_space<vmem>>, %arg6: memref<1x4x8x8xbf16, #tpu.memory_space<vmem>>, %arg7: memref<32x1xf32, #tpu.memory_space<vmem>>, %arg8: memref<32x1xf32, #tpu.memory_space<vmem>>, %arg9: memref<32x8xf32, #tpu.memory_space<vmem>>) attributes {dimension_semantics = [#tpu.dimension_semantics<parallel>, #tpu.dimension_semantics<parallel>, #tpu.dimension_semantics<arbitrary>], iteration_bounds = array<i64: 2, 2, 2>, scalar_prefetch = 0 : i64, scratch_operands = 3 : i64, tpu.core_type = #tpu.core_type<tc>, window_params = [{transform_indices = @transform_0, window_bounds = array<i64: 1, 4, 8, 8>}, {transform_indices = @transform_1, window_bounds = array<i64: 1, 8, 8>}, {transform_indices = @transform_2, window_bounds = array<i64: 1, 8, 8>}, {transform_indices = @transform_3, window_bounds = array<i64: 1, 4, 8, 8>}]} {
    %c0_i32 = arith.constant 0 : i32
    %0 = arith.cmpi eq, %arg2, %c0_i32 : i32
    %1 = arith.extui %0 : i1 to i32
    %c0_i32_0 = arith.constant 0 : i32
    %2 = arith.cmpi ne, %1, %c0_i32_0 : i32
    scf.if %2 {
      %cst_26 = arith.constant 0xFF800000 : f32
      %37 = vector.broadcast %cst_26 : f32 to vector<32x1xf32>
      %c0_27 = arith.constant 0 : index
      %c0_28 = arith.constant 0 : index
      %38 = vector.load %arg7[%c0_27, %c0_28] : memref<32x1xf32, #tpu.memory_space<vmem>>, vector<32x1xf32>
      tpu.vector_store %arg7[%c0_27, %c0_28], %37 {strides = array<i32>} : memref<32x1xf32, #tpu.memory_space<vmem>>, vector<32x1xf32>,
      %cst_29 = arith.constant 0.000000e+00 : f32
      %39 = vector.broadcast %cst_29 : f32 to vector<32x1xf32>
      %c0_30 = arith.constant 0 : index
      %c0_31 = arith.constant 0 : index
      %40 = vector.load %arg8[%c0_30, %c0_31] : memref<32x1xf32, #tpu.memory_space<vmem>>, vector<32x1xf32>
      tpu.vector_store %arg8[%c0_30, %c0_31], %39 {strides = array<i32>} : memref<32x1xf32, #tpu.memory_space<vmem>>, vector<32x1xf32>,
      %cst_32 = arith.constant 0.000000e+00 : f32
      %41 = vector.broadcast %cst_32 : f32 to vector<32x8xf32>
      %c0_33 = arith.constant 0 : index
      %c0_34 = arith.constant 0 : index
      %42 = vector.load %arg9[%c0_33, %c0_34] : memref<32x8xf32, #tpu.memory_space<vmem>>, vector<32x8xf32>
      tpu.vector_store %arg9[%c0_33, %c0_34], %41 {strides = array<i32>} : memref<32x8xf32, #tpu.memory_space<vmem>>, vector<32x8xf32>,
    } else {
    }
    %c0 = arith.constant 0 : index
    %c0_1 = arith.constant 0 : index
    %c0_2 = arith.constant 0 : index
    %c0_3 = arith.constant 0 : index
    %3 = vector.load %arg3[%c0, %c0_1, %c0_2, %c0_3] : memref<1x4x8x8xbf16, #tpu.memory_space<vmem>>, vector<1x4x8x8xbf16>
    %4 = vector.shape_cast %3 : vector<1x4x8x8xbf16> to vector<4x8x8xbf16>
    %5 = vector.shape_cast %4 : vector<4x8x8xbf16> to vector<32x8xbf16>
    %c0_4 = arith.constant 0 : index
    %c0_5 = arith.constant 0 : index
    %c0_6 = arith.constant 0 : index
    %6 = vector.load %arg4[%c0_4, %c0_5, %c0_6] : memref<1x8x8xbf16, #tpu.memory_space<vmem>>, vector<1x8x8xbf16>
    %7 = vector.shape_cast %6 : vector<1x8x8xbf16> to vector<8x8xbf16>
    %c0_7 = arith.constant 0 : index
    %c0_8 = arith.constant 0 : index
    %c0_9 = arith.constant 0 : index
    %8 = vector.load %arg5[%c0_7, %c0_8, %c0_9] : memref<1x8x8xbf16, #tpu.memory_space<vmem>>, vector<1x8x8xbf16>
    %9 = vector.shape_cast %8 : vector<1x8x8xbf16> to vector<8x8xbf16>
    %cst = arith.constant dense<0.000000e+00> : vector<32x8xf32>
    %10 = tpu.matmul %5, %7, %cst {dimension_numbers = #tpu.dot_dimension_numbers<[1], [1], [0], [0], [0, 0, 1, 0], [], []>} : vector<32x8xbf16>, vector<8x8xbf16>, vector<32x8xf32> -> vector<32x8xf32>
    %c0_10 = arith.constant 0 : index
    %c0_11 = arith.constant 0 : index
    %11 = vector.load %arg7[%c0_10, %c0_11] : memref<32x1xf32, #tpu.memory_space<vmem>>, vector<32x1xf32>
    %cst_12 = arith.constant dense<0xFF800000> : vector<32xf32>
    %12 = vector.multi_reduction <maximumf>, %10, %cst_12 [1] : vector<32x8xf32> to vector<32xf32>
    %13 = vector.shape_cast %12 : vector<32xf32> to vector<32x1xf32>
    %14 = arith.maximumf %11, %13 : vector<32x1xf32>
    %15 = arith.subf %11, %14 : vector<32x1xf32>
    %16 = math.exp %15 : vector<32x1xf32>
    %17 = vector.broadcast %14 : vector<32x1xf32> to vector<32x8xf32>
    %18 = arith.subf %10, %17 : vector<32x8xf32>
    %19 = math.exp %18 : vector<32x8xf32>
    %c0_13 = arith.constant 0 : index
    %c0_14 = arith.constant 0 : index
    %20 = vector.load %arg8[%c0_13, %c0_14] : memref<32x1xf32, #tpu.memory_space<vmem>>, vector<32x1xf32>
    %21 = arith.mulf %16, %20 : vector<32x1xf32>
    %cst_15 = arith.constant dense<0.000000e+00> : vector<32xf32>
    %22 = vector.multi_reduction <add>, %19, %cst_15 [1] : vector<32x8xf32> to vector<32xf32>
    %23 = vector.shape_cast %22 : vector<32xf32> to vector<32x1xf32>
    %24 = arith.addf %21, %23 : vector<32x1xf32>
    %c0_16 = arith.constant 0 : index
    %c0_17 = arith.constant 0 : index
    %25 = vector.load %arg8[%c0_16, %c0_17] : memref<32x1xf32, #tpu.memory_space<vmem>>, vector<32x1xf32>
    tpu.vector_store %arg8[%c0_16, %c0_17], %24 {strides = array<i32>} : memref<32x1xf32, #tpu.memory_space<vmem>>, vector<32x1xf32>,
    %c0_18 = arith.constant 0 : index
    %c0_19 = arith.constant 0 : index
    %26 = vector.load %arg9[%c0_18, %c0_19] : memref<32x8xf32, #tpu.memory_space<vmem>>, vector<32x8xf32>
    %27 = vector.broadcast %16 : vector<32x1xf32> to vector<32x8xf32>
    %28 = arith.mulf %27, %26 : vector<32x8xf32>
    %29 = arith.truncf %19 : vector<32x8xf32> to vector<32x8xbf16>
    %cst_20 = arith.constant dense<0.000000e+00> : vector<32x8xf32>
    %30 = tpu.matmul %29, %9, %cst_20 {dimension_numbers = #tpu.dot_dimension_numbers<[1], [0], [0], [1], [0, 0, 1, 1], [], []>} : vector<32x8xbf16>, vector<8x8xbf16>, vector<32x8xf32> -> vector<32x8xf32>
    %31 = arith.addf %28, %30 : vector<32x8xf32>
    %c0_21 = arith.constant 0 : index
    %c0_22 = arith.constant 0 : index
    %32 = vector.load %arg9[%c0_21, %c0_22] : memref<32x8xf32, #tpu.memory_space<vmem>>, vector<32x8xf32>
    tpu.vector_store %arg9[%c0_21, %c0_22], %31 {strides = array<i32>} : memref<32x8xf32, #tpu.memory_space<vmem>>, vector<32x8xf32>,
    %c0_23 = arith.constant 0 : index
    %c0_24 = arith.constant 0 : index
    %33 = vector.load %arg7[%c0_23, %c0_24] : memref<32x1xf32, #tpu.memory_space<vmem>>, vector<32x1xf32>
    tpu.vector_store %arg7[%c0_23, %c0_24], %14 {strides = array<i32>} : memref<32x1xf32, #tpu.memory_space<vmem>>, vector<32x1xf32>,
    %c1_i32 = arith.constant 1 : i32
    %34 = arith.cmpi eq, %arg2, %c1_i32 : i32
    %35 = arith.extui %34 : i1 to i32
    %c0_i32_25 = arith.constant 0 : i32
    %36 = arith.cmpi ne, %35, %c0_i32_25 : i32
    scf.if %36 {
      %c0_26 = arith.constant 0 : index
      %c0_27 = arith.constant 0 : index
      %37 = vector.load %arg9[%c0_26, %c0_27] : memref<32x8xf32, #tpu.memory_space<vmem>>, vector<32x8xf32>
      %c0_28 = arith.constant 0 : index
      %c0_29 = arith.constant 0 : index
      %38 = vector.load %arg8[%c0_28, %c0_29] : memref<32x1xf32, #tpu.memory_space<vmem>>, vector<32x1xf32>
      %39 = tpu.reciprocal %38 {approx = true} : vector<32x1xf32> -> vector<32x1xf32>
      %40 = vector.broadcast %39 : vector<32x1xf32> to vector<32x8xf32>
      %41 = arith.mulf %37, %40 : vector<32x8xf32>
      %42 = vector.shape_cast %41 : vector<32x8xf32> to vector<4x8x8xf32>
      %43 = arith.truncf %42 : vector<4x8x8xf32> to vector<4x8x8xbf16>
      %c0_30 = arith.constant 0 : index
      %c0_31 = arith.constant 0 : index
      %c0_32 = arith.constant 0 : index
      %c0_33 = arith.constant 0 : index
      %44 = vector.load %arg6[%c0_30, %c0_31, %c0_32, %c0_33] : memref<1x4x8x8xbf16, #tpu.memory_space<vmem>>, vector<1x4x8x8xbf16>
      %45 = vector.shape_cast %44 : vector<1x4x8x8xbf16> to vector<4x8x8xbf16>
      %46 = vector.shape_cast %43 : vector<4x8x8xbf16> to vector<1x4x8x8xbf16>
      tpu.vector_store %arg6[%c0_30, %c0_31, %c0_32, %c0_33], %46 {strides = array<i32>} : memref<1x4x8x8xbf16, #tpu.memory_space<vmem>>, vector<1x4x8x8xbf16>,
    } else {
    }
    return
  }
  func.func @transform_0(%arg0: i32, %arg1: i32, %arg2: i32) -> (i32, i32, i32, i32) {
    %c0_i32 = arith.constant 0 : i32
    %c0_i32_0 = arith.constant 0 : i32
    %c0_i32_1 = arith.constant 0 : i32
    return %arg0, %c0_i32, %arg1, %c0_i32_0 : i32, i32, i32, i32
  }
  func.func @transform_1(%arg0: i32, %arg1: i32, %arg2: i32) -> (i32, i32, i32) {
    %c0_i32 = arith.constant 0 : i32
    %c0_i32_0 = arith.constant 0 : i32
    return %arg0, %arg2, %c0_i32 : i32, i32, i32
  }
  func.func @transform_2(%arg0: i32, %arg1: i32, %arg2: i32) -> (i32, i32, i32) {
    %c0_i32 = arith.constant 0 : i32
    %c0_i32_0 = arith.constant 0 : i32
    return %arg0, %arg2, %c0_i32 : i32, i32, i32
  }
  func.func @transform_3(%arg0: i32, %arg1: i32, %arg2: i32) -> (i32, i32, i32, i32) {
    %c0_i32 = arith.constant 0 : i32
    %c0_i32_0 = arith.constant 0 : i32
    %c0_i32_1 = arith.constant 0 : i32
    return %arg0, %c0_i32, %arg1, %c0_i32_0 : i32, i32, i32, i32
  }
}

</mosaic_0001>

<bundles_post_ra>
// kernel: tpu_custom_call.1
= control target key start
LH: loop header
LB: loop body
LE: loop exit
PB: predicated region body
PF: predicated region fallthrough
CT: control target
= control target key end

     0   :  { %s1071_s12 = smov 0   ;;  %s1073_s13 = smov 0   ;;  %s1252_s0 = inlined_call_operand.vmem [shape: bf16[2,4,16,8], index: 0, kind: input, shape index: {}]   ;;  %s1253_s1 = inlined_call_operand.vmem [shape: bf16[2,16,8], index: 1, kind: input, shape index: {}]   ;;  %s1254_s2 = inlined_call_operand.vmem [shape: bf16[2,16,8], index: 2, kind: input, shape index: {}]   ;;  %s1255_s3 = inlined_call_operand.vmem [shape: bf16[2,4,16,8], index: 3, kind: output, shape index: {}]  }
   0x1   :  { %s1075_s14 = smov 0   ;;  %s1077_s15 = smov 0  }
   0x2   :  { %s1079_s16 = smov 0   ;;  %s1081_s17 = smov 0  }
   0x3   :  { %s1083_s18 = smov 0   ;;  %s1085_s19 = smov 0  }
   0x4   :  { %s1087_s20 = smov 0  }
   0x5 LB: > { %s25_s21 = sadd.s32 1, %s1033_s17  ;;  %s28_s22 = sadd.s32 1, %s1037_s18  ;;  %s1045_s20 = sphi %s1087_s20, %s13_s20   ;;  %s1041_s19 = sphi %s1085_s19, %s1265_s19   ;;  %s1037_s18 = sphi %s1083_s18, %s1264_s18   ;;  %s1033_s17 = sphi %s1081_s17, %s1263_s17   ;;  %s1029_s16 = sphi %s1079_s16, %s1262_s16   ;;  %s1025_s15 = sphi %s1077_s15, %s1261_s15   ;;  %s1021_s14 = sphi %s1075_s14, %s1260_s14   ;;  %s1017_s13 = sphi %s1073_s13, %s1259_s13   ;;  %s1013_s12 = sphi %s1071_s12, %s1258_s12  }
   0x6   : > { %p26_p0 = scmp.ge.s32.totalorder %s25_s21, 2  ;;  %s822_s23 = sadd.s32 4294967295, %s1045_s20  }
   0x7   : > { %s32_s24 = sadd.s32 1, %s1041_s19  ;;  %p48_p1 = scmp.ne.s32.totalorder %s1017_s13, %s1013_s12 }
   0x8   : > { %s1267_s21 = smov (%p26_p0, %s25_s21), 0  ;;  %s1269_s22 = smov (!%p26_p0, %s28_s22), %s1037_s18 }
   0x9   : > { %p49_p2 = scmp.eq.s32.totalorder %s1045_s20, 0  ;;  %p30_p3 = scmp.ge.s32.totalorder %s1269_s22, 2 }
   0xa   : > { %p136_p4 = scmp.eq.s32.totalorder %s822_s23, 7  ;;  %s41_s30 = sadd.s32 1, %s1017_s13 }
   0xb   : > { %p1126_p5 = por %p49_p2, %p48_p1  ;;  %s1271_s22 = smov (%p30_p3, %s1269_s22), 0 }
   0xc   : > { %s1273_s24 = smov (!%p30_p3, %s32_s24), %s1041_s19  ;;  %p1133_p6 = por %p136_p4, %p48_p1 }
   0xd   : > { %p34_p7 = scmp.ge.s32.totalorder %s1273_s24, 2  ;;  %s37_s27 = ssub.s32 %s1037_s18, %s1271_s22 }
   0xe   : > { %p825_p9 = scmp.ge.s32.totalorder %s1045_s20, 8 }
   0xf   : > { %s1275_s24 = smov (%p34_p7, %s1273_s24), 0 }
  0x10   : > { %s36_s28 = ssub.s32 %s1041_s19, %s1275_s24  ;;  %158 = sbr.rel (%p825_p9) target bundleno = 29 (0x1d), region = 16 }
  0x11   : > { %s38_s29 = sor.u32 %s37_s27, %s36_s28 }
  0x12   : > { %p39_p8 = scmp.eq.s32.totalorder %s38_s29, 0 }
  0x14   : > { %s1145_s4 = scalar_select %p39_p8, %s1017_s13, %s41_s30  }
  0x15   : > { %161 = sbr.rel (!%p1126_p5) target bundleno = 29 (0x1d), region = 20  ;;  %s163_s5 = sand.u32 (%p1126_p5), 1, %s1017_s13  }
  0x16   : > { %s827_s6 = sshll.u32 (%p1126_p5), %s1041_s19, 3  ;;  %s826_s7 = sshll.u32 (%p1126_p5), %s163_s5, 4 }
  0x17   : > { %s167_s8 = sadd.s32 (%p1126_p5), %s1037_s18, %s827_s6  ;;  %s165_s27 = scalar_lea.vmem (%p1126_p5), [#allocation5], %s826_s7 }
  0x18   : > { %s828_s9 = sshll.u32 (%p1126_p5), %s167_s8, 2 }
  0x19   : > { %s169_s23 = scalar_lea.vmem (%p1126_p5), %s1252_s0, %s828_s9 }
  0x1a   : > { %v186_v0 = vld [vmem:[%s169_s23] sm:$0xf]  ;;  %v188_v1 = vld [vmem:[%s169_s23 + $0x8] sm:$0xf]  ;;  %v190_v2 = vld [vmem:[%s169_s23 + $0x10] sm:$0xf] }
  0x1b   : > { %187 = vst [vmem:[%s165_s27] sm:$0xf] %v186_v0  ;;  %189 = vst [vmem:[%s165_s27 + $0x4] sm:$0xf] %v188_v1  ;;  %v192_v3 = vld [vmem:[%s169_s23 + $0x18] sm:$0xf] }
  0x1c   : > { %191 = vst [vmem:[%s165_s27 + $0x8] sm:$0xf] %v190_v2  ;;  %193 = vst [vmem:[%s165_s27 + $0xc] sm:$0xf] %v192_v3 }
  0x1d PF: > { %p829_p10 = scmp.ge.s32.totalorder %s1045_s20, 1  ;;  %p246_p11 = scmp.lt.s32.totalorder %s1045_s20, 9 }
  0x1f   : > { %p247_p12 = pnand %p829_p10, %p246_p11 }
  0x20   : > { %s253_s25 = sand.u32 (!%p247_p12), 1, %s1013_s12   ;;  %p291_p13 = scmp.lt.s32.totalorder (!%p247_p12), %s1029_s16, 1 }
  0x21   : > { %250 = sbr.rel (%p247_p12) target bundleno = 908 (0x38c), region = 69  ;;  %s1160_s28 = sshll.u32 (!%p247_p12), %s253_s25, 4 }
  0x22   : > { %p293_p0 = scmp.lt.s32.totalorder (!%p247_p12), %s1021_s14, 1  ;;  %s255_s12 = scalar_lea.vmem (!%p247_p12), [#allocation5], %s1160_s28 }
  0x23   : > { %s1175_s25 = scalar_lea.vmem (!%p247_p12), [#allocation6], %s1160_s28  ;;  %p836_p1 = scmp.ne.s32.totalorder (!%p247_p12), %s1021_s14, 0 }
  0x26   : > { %s292_s29 = scalar_select %p291_p13, %s1029_s16, 1 }
  0x27   : > { %s294_s30 = scalar_select %p293_p0, %s1021_s14, 1 }
  0x28   : > { %s832_s5 = sshll.u32 %s292_s29, 1  ;;  %311 = sbr.rel (%p836_p1) target bundleno = 52 (0x34), region = 77 }
  0x29   : > { %s296_s6 = sadd.s32 %s832_s5, %s294_s30 }
  0x2a   : > { %s833_s7 = sshll.u32 %s296_s6, 2 }
  0x2b   : > { %s298_s10 = scalar_lea.vmem %s1253_s1, %s833_s7  ;;  %s1171_s27 = scalar_lea.vmem %s1254_s2, %s833_s7 }
  0x2d   : > { %vm312_vm0 = vcmask 7168   ;;  %vm321_vm1 = vcmask 64512   ;;  %v1047_v4 = vmov -inf   ;;  %v1048_v5 = vmov 0.0  }
  0x2e   : > { %313 = vst.msk [vmem:[#allocation2] sm:$0xff] %vm312_vm0, %v1047_v4  ;;  %314 = vst.msk [vmem:[#allocation2 + $0x8] sm:$0xff] %vm312_vm0, %v1047_v4 }
  0x2f   : > { %315 = vst.msk [vmem:[#allocation2 + $0x10] sm:$0xff] %vm312_vm0, %v1047_v4  ;;  %316 = vst.msk [vmem:[#allocation2 + $0x18] sm:$0xff] %vm312_vm0, %v1047_v4 }
  0x30   : > { %317 = vst.msk [vmem:[#allocation3] sm:$0xff] %vm312_vm0, %v1048_v5  ;;  %318 = vst.msk [vmem:[#allocation3 + $0x8] sm:$0xff] %vm312_vm0, %v1048_v5 }
  0x31   : > { %319 = vst.msk [vmem:[#allocation3 + $0x10] sm:$0xff] %vm312_vm0, %v1048_v5  ;;  %320 = vst.msk [vmem:[#allocation3 + $0x18] sm:$0xff] %vm312_vm0, %v1048_v5 }
  0x32   : > { %322 = vst.msk [vmem:[#allocation4] sm:$0xff] %vm321_vm1, %v1048_v5  ;;  %323 = vst.msk [vmem:[#allocation4 + $0x8] sm:$0xff] %vm321_vm1, %v1048_v5 }
  0x33   : > { %324 = vst.msk [vmem:[#allocation4 + $0x10] sm:$0xff] %vm321_vm1, %v1048_v5  ;;  %325 = vst.msk [vmem:[#allocation4 + $0x18] sm:$0xff] %vm321_vm1, %v1048_v5 }
  0x34 PF: > { %v330_v6 = vld [vmem:[%s298_s10] sm:$0xf]  ;;  %vm342_vm2 = vcmask 64512   ;;  %v948_v9 = vld [vmem:[%s255_s12 + $0x8] sm:$0xff]   ;;  %v1049_v18 = vmov 0   ;;  %vm489_vm3 = vcmask 7168  }
  0x35   : > { %v947_v7 = vld [vmem:[%s255_s12] sm:$0xff]   ;;  %867 = vmatprep.subr.msk.bf16.mxu0 %vm342_vm2, %v330_v6  ;;  %v350_v8 = vsel %vm342_vm2, %v330_v6, 0  ;;  %946 = vset.pattern.permute.xlu1 %v1049_v18  ;;  %v402_v28 = vld [vmem:[#allocation2 + $0x8] sm:$0xff]  ;;  %vm530_vm4 = vcmask 1043456   ;;  %p843_p2 = scmp.ne.s32.totalorder %s1021_s14, 1 }
  0x36   : > { %856 = vmatpush3.bf16.xpose.msra.mxu0 %v350_v8  ;;  %857 = vmatprep.mubr.msk.bf16.mxu0 %vm342_vm2, %v947_v7  ;;  %v403_v19 = vld [vmem:[#allocation2 + $0x10] sm:$0xff]  ;;  %v401_v21 = vld [vmem:[#allocation2] sm:$0xff]  ;;  %v1186_v24 = vld [vmem:[#allocation2 + $0x18] sm:$0xff] }
  0x37   : > { %945 = vset.pattern.permute.xlu0 %v1049_v18  ;;  %v331_v37 = vld [vmem:[%s1171_s27] sm:$0xf] }
  0x38   : > { %868 = vmatprep.subr.msk.bf16.mxu1 %vm530_vm4, %v331_v37  ;;  %v532_v38 = vsel %vm530_vm4, %v331_v37, 0  ;;  %v467_v4 = vld [vmem:[#allocation3 + $0x10] sm:$0xff]  ;;  %v465_v7 = vld [vmem:[#allocation3] sm:$0xff] }
  0x39   : > { %862 = vmatpush3.bf16.msra.mxu1 %v532_v38 }
  0x3d   : > { %858 = vmatmul.mubr.msk.bf16.vlgmr.msra.gmra.mxu0 %vm342_vm2, %v948_v9  ;;  %v466_v9 = vld [vmem:[#allocation3 + $0x8] sm:$0xff] }
  0xfd   : > { %v859_v10 = vpop.f32.mrf.mxu0 }
  0xfe   : > { %v411_v11 = vsel %vm342_vm2, %v859_v10, -inf }
  0xff   : > { %412 = vmax.xlane.f32.xlu1 %v411_v11  ;;  %v386_v12 = vpop.f32.mrf.mxu0 }
 0x100   : > { %v405_v13 = vsel %vm342_vm2, %v386_v12, -inf }
 0x101   : > { %406 = vmax.xlane.f32.xlu0 %v405_v13  ;;  %v860_v14 = vpop.f32.mrf.mxu0 }
 0x102   : > { %v414_v15 = vsel %vm342_vm2, %v860_v14, -inf }
 0x103   : > { %415 = vmax.xlane.f32.xlu1 %v414_v15  ;;  %v389_v16 = vpop.f32.mrf.mxu0  ;;  %v468_v15 = vld [vmem:[#allocation3 + $0x18] sm:$0xff] }
 0x104   : > { %v408_v17 = vsel %vm342_vm2, %v389_v16, -inf }
 0x105   : > { %409 = vmax.xlane.f32.xlu0 %v408_v17 }
 0x188   : > { %v413_v20 = vpop.xlane.xlu1 %412 }
 0x189   : > { %v419_v22 = vmax.f32 %v403_v19, %v413_v20 }
 0x18a   : > { %v407_v23 = vpop.xlane.xlu0 %406 }
 0x18b   : > { %v423_v25 = vsub.f32 %v403_v19, %v419_v22  ;;  %593 = vst.msk [vmem:[#allocation2 + $0x10] sm:$0xff] %vm489_vm3, %v419_v22  ;;  %v417_v26 = vmax.f32 %v401_v21, %v407_v23  ;;  %445 = vperm.xlu1 %946, %v419_v22   ;;  %v494_v22 = vld [vmem:[#allocation4] sm:$0xff] }
 0x18c   : > { %v416_v27 = vpop.xlane.xlu1 %415 }
 0x18d   : > { %v421_v29 = vsub.f32 %v401_v21, %v417_v26  ;;  %591 = vst.msk [vmem:[#allocation2] sm:$0xff] %vm489_vm3, %v417_v26  ;;  %v420_v30 = vmax.f32 %v1186_v24, %v416_v27  ;;  %435 = vperm.xlu0 %945, %v417_v26   ;;  %v429_v59 = vmul.f32 1.442695, %v423_v25  ;;  %v496_v21 = vld [vmem:[#allocation4 + $0x10] sm:$0xff] }
 0x18e   : > { %v410_v31 = vpop.xlane.xlu0 %409 }
 0x18f   : > { %v425_v32 = vmul.f32 1.442695, %v421_v29  ;;  %v424_v33 = vsub.f32 %v1186_v24, %v420_v30  ;;  %594 = vst.msk [vmem:[#allocation2 + $0x18] sm:$0xff] %vm489_vm3, %v420_v30  ;;  %v418_v34 = vmax.f32 %v402_v28, %v410_v31  ;;  %v497_v24 = vld [vmem:[#allocation4 + $0x18] sm:$0xff]  ;;  %v495_v29 = vld [vmem:[#allocation4 + $0x8] sm:$0xff] }
 0x191   : > { %949 = vpow2.f32 %v425_v32  ;;  %v422_v35 = vsub.f32 %v402_v28, %v418_v34  ;;  %592 = vst.msk [vmem:[#allocation2 + $0x8] sm:$0xff] %vm489_vm3, %v418_v34  ;;  %440 = vperm.xlu1 %946, %v418_v34   ;;  %v431_v63 = vmul.f32 1.442695, %v424_v33 }
 0x193   : > { %v427_v62 = vmul.f32 1.442695, %v422_v35 }
 0x195   : > { %450 = vperm.xlu1 %946, %v420_v30  }
 0x19e   : > { %v950_v36 = vpop.eup %949 }
 0x19f   : > { %500 = vperm.xlu1 %946, %v950_v36  }
 0x206   : > { %v446_v39 = vpop.permute.xlu1 %445 }
 0x207   : > { %v455_v40 = vsub.f32 %v859_v10, %v446_v39  ;;  %v469_v10 = vmul.f32 %v950_v36, %v465_v7 }
 0x208   : > { %v436_v41 = vpop.permute.xlu0 %435 }
 0x209   : > { %v461_v42 = vmul.f32 1.442695, %v455_v40  ;;  %v453_v43 = vsub.f32 %v386_v12, %v436_v41 }
 0x20b   : > { %951 = vpow2.f32 %v461_v42  ;;  %v457_v44 = vmul.f32 1.442695, %v453_v43 }
 0x20c   : > { %v441_v45 = vpop.permute.xlu1 %440 }
 0x20d   : > { %953 = vpow2.f32 %v457_v44  ;;  %v454_v46 = vsub.f32 %v389_v16, %v441_v45 }
 0x20f   : > { %v459_v47 = vmul.f32 1.442695, %v454_v46 }
 0x210   : > { %v451_v48 = vpop.permute.xlu1 %450 }
 0x211   : > { %955 = vpow2.f32 %v459_v47  ;;  %v456_v49 = vsub.f32 %v860_v14, %v451_v48 }
 0x213   : > { %v463_v50 = vmul.f32 1.442695, %v456_v49 }
 0x215   : > { %957 = vpow2.f32 %v463_v50 }
 0x216   : > { %959 = vpow2.f32 %v429_v59 }
 0x217   : > { %961 = vpow2.f32 %v427_v62 }
 0x218   : > { %v952_v51 = vpop.eup %951  ;;  %963 = vpow2.f32 %v431_v63 }
 0x219   : > { %v479_v52 = vsel %vm342_vm2, %v952_v51, 0.0 }
 0x21a   : > { %v954_v53 = vpop.eup %953  ;;  %480 = vadd.xlane.f32.xlu1 %v479_v52  ;;  %v501_v3 = vpop.permute.xlu1 %500 }
 0x21b   : > { %v473_v54 = vsel %vm342_vm2, %v954_v53, 0.0  ;;  %v518_v27 = vmul.f32 %v501_v3, %v494_v22 }
 0x21e   : > { %v956_v55 = vpop.eup %955  ;;  %474 = vadd.xlane.f32.xlu1 %v473_v54 }
 0x21f   : > { %v476_v56 = vsel %vm342_vm2, %v956_v55, 0.0  ;;  %v522_v57 = vpack.c.bf16 %v956_v55, %v954_v53 }
 0x220   : > { %477 = vadd.xlane.f32.xlu0 %v476_v56 }
 0x221   : > { %863 = vmatprep.mubr.msk.bf16.mxu1 %vm342_vm2, %v522_v57 }
 0x222   : > { %v958_v58 = vpop.eup %957 }
 0x223   : > { %v482_v60 = vsel %vm342_vm2, %v958_v58, 0.0  ;;  %v523_v61 = vpack.c.bf16 %v958_v58, %v952_v51  ;;  %v960_v0 = vpop.eup %959 }
 0x224   : > { %483 = vadd.xlane.f32.xlu1 %v482_v60  ;;  %v962_v1 = vpop.eup %961  ;;  %v471_v5 = vmul.f32 %v960_v0, %v467_v4 }
 0x225   : > { %864 = vmatmul.mubr.msk.bf16.vlgmr.msra.gmra.mxu1 %vm342_vm2, %v523_v61  ;;  %v964_v2 = vpop.eup %963  ;;  %v470_v13 = vmul.f32 %v962_v1, %v466_v9 }
 0x226   : > { %v472_v17 = vmul.f32 %v964_v2, %v468_v15 }
 0x235   : > { %510 = vperm.xlu1 %946, %v960_v0  }
 0x236   : > { %505 = vperm.xlu0 %945, %v962_v1  }
 0x239   : > { %515 = vperm.xlu1 %946, %v964_v2  }
 0x2a3   : > { %v481_v6 = vpop.xlane.xlu1 %480 }
 0x2a4   : > { %v487_v8 = vadd.f32 %v481_v6, %v471_v5 }
 0x2a6   : > { %492 = vst.msk [vmem:[#allocation3 + $0x10] sm:$0xff] %vm489_vm3, %v487_v8 }
 0x2a7   : > { %v475_v11 = vpop.xlane.xlu1 %474 }
 0x2a8   : > { %v485_v12 = vadd.f32 %v475_v11, %v469_v10 }
 0x2a9   : > { %v478_v14 = vpop.xlane.xlu0 %477 }
 0x2aa   : > { %490 = vst.msk [vmem:[#allocation3] sm:$0xff] %vm489_vm3, %v485_v12  ;;  %v486_v16 = vadd.f32 %v478_v14, %v470_v13 }
 0x2ac   : > { %491 = vst.msk [vmem:[#allocation3 + $0x8] sm:$0xff] %vm489_vm3, %v486_v16 }
 0x2ad   : > { %v484_v18 = vpop.xlane.xlu1 %483 }
 0x2ae   : > { %v488_v19 = vadd.f32 %v484_v18, %v472_v17 }
 0x2b0   : > { %493 = vst.msk [vmem:[#allocation3 + $0x18] sm:$0xff] %vm489_vm3, %v488_v19 }
 0x2b1   : > { %v511_v20 = vpop.permute.xlu1 %510  ;;  %v506_v30 = vpop.permute.xlu0 %505 }
 0x2b2   : > { %v520_v23 = vmul.f32 %v511_v20, %v496_v21  ;;  %v519_v35 = vmul.f32 %v506_v30, %v495_v29 }
 0x2b5   : > { %v516_v25 = vpop.permute.xlu1 %515 }
 0x2b6   : > { %v521_v32 = vmul.f32 %v516_v25, %v497_v24 }
 0x2e5   : > { %v865_v26 = vpop.f32.mrf.mxu1 }
 0x2e6   : > { %v585_v28 = vadd.f32 %v865_v26, %v520_v23 }
 0x2e7   : > { %v568_v31 = vpop.f32.mrf.mxu1 }
 0x2e8   : > { %589 = vst.msk [vmem:[#allocation4 + $0x10] sm:$0xff] %vm342_vm2, %v585_v28  ;;  %v583_v33 = vadd.f32 %v568_v31, %v518_v27 }
 0x2e9   : > { %v866_v34 = vpop.f32.mrf.mxu1 }
 0x2ea   : > { %587 = vst.msk [vmem:[#allocation4] sm:$0xff] %vm342_vm2, %v583_v33  ;;  %v586_v36 = vadd.f32 %v866_v34, %v521_v32  ;;  %598 = sbr.rel (%p843_p2) target bundleno = 900 (0x384), region = 81 }
 0x2eb   : > { %v571_v37 = vpop.f32.mrf.mxu1 }
 0x2ec   : > { %590 = vst.msk [vmem:[#allocation4 + $0x18] sm:$0xff] %vm342_vm2, %v586_v36  ;;  %v584_v38 = vadd.f32 %v571_v37, %v519_v35 }
 0x2ee   : > { %588 = vst.msk [vmem:[#allocation4 + $0x8] sm:$0xff] %vm342_vm2, %v584_v38 }
 0x2ef   : > { %v605_v39 = vld [vmem:[#allocation3 + $0x10] sm:$0xff]  ;;  %v603_v40 = vld [vmem:[#allocation3] sm:$0xff]  ;;  %v606_v41 = vld [vmem:[#allocation3 + $0x18] sm:$0xff]  ;;  %v1050_v42 = vmov 0   ;;  %vm639_vm5 = vcmask 60416  }
 0x2f0   : > { %966 = vset.pattern.permute.xlu1 %v1050_v42  ;;  %965 = vset.pattern.permute.xlu0 %v1050_v42  ;;  %967 = vrcp.f32 %v605_v39  ;;  %v604_v43 = vld [vmem:[#allocation3 + $0x8] sm:$0xff]  ;;  %v601_v48 = vld [vmem:[#allocation4 + $0x10] sm:$0xff] }
 0x2f1   : > { %969 = vrcp.f32 %v603_v40  ;;  %v599_v49 = vld [vmem:[#allocation4] sm:$0xff] }
 0x2f2   : > { %971 = vrcp.f32 %v606_v41 }
 0x2f3   : > { %973 = vrcp.f32 %v604_v43  ;;  %v602_v54 = vld [vmem:[#allocation4 + $0x18] sm:$0xff] }
 0x2f5   : > { %v600_v56 = vld [vmem:[#allocation4 + $0x8] sm:$0xff] }
 0x2fd   : > { %v968_v44 = vpop.eup %967 }
 0x2fe   : > { %v970_v45 = vpop.eup %969  ;;  %623 = vperm.xlu1 %966, %v968_v44  }
 0x2ff   : > { %v972_v46 = vpop.eup %971  ;;  %613 = vperm.xlu0 %965, %v970_v45  }
 0x300   : > { %v974_v47 = vpop.eup %973 }
 0x302   : > { %628 = vperm.xlu1 %966, %v972_v46  }
 0x303   : > { %618 = vperm.xlu0 %965, %v974_v47  }
 0x379   : > { %v624_v50 = vpop.permute.xlu1 %623 }
 0x37a   : > { %v633_v51 = vmul.f32 %v624_v50, %v601_v48  ;;  %v614_v52 = vpop.permute.xlu0 %613 }
 0x37b   : > { %v631_v53 = vmul.f32 %v614_v52, %v599_v49 }
 0x37c   : > { %v637_v55 = vpack.c.bf16 %v633_v51, %v633_v51 }
 0x37d   : > { %v635_v57 = vpack.c.bf16 %v631_v53, %v631_v53  ;;  %v629_v58 = vpop.permute.xlu1 %628 }
 0x37e   : > { %642 = vst.msk [vmem:[%s1175_s25 + $0x8] sm:$0xf] %vm639_vm5, %v637_v55  ;;  %v634_v59 = vmul.f32 %v629_v58, %v602_v54  ;;  %v619_v60 = vpop.permute.xlu0 %618 }
 0x37f   : > { %640 = vst.msk [vmem:[%s1175_s25] sm:$0xf] %vm639_vm5, %v635_v57  ;;  %v632_v61 = vmul.f32 %v619_v60, %v600_v56 }
 0x380   : > { %v638_v62 = vpack.c.bf16 %v634_v59, %v634_v59 }
 0x381   : > { %v636_v63 = vpack.c.bf16 %v632_v61, %v632_v61 }
 0x382   : > { %643 = vst.msk [vmem:[%s1175_s25 + $0xc] sm:$0xf] %vm639_vm5, %v638_v62 }
 0x383   : > { %641 = vst.msk [vmem:[%s1175_s25 + $0x4] sm:$0xf] %vm639_vm5, %v636_v63 }
 0x384 PF: > { %650 = sbr.rel (!%p1133_p6) target bundleno = 908 (0x38c), region = 85  ;;  %s845_s14 = sshll.u32 (%p1133_p6), %s1029_s16, 3 }
 0x385   : > { %s652_s28 = sadd.s32 (%p1133_p6), %s1025_s15, %s845_s14  ;;  %v675_v2 = vld [vmem:[%s1175_s25 + $0x8] sm:$0xf] (%p1133_p6) }
 0x386   : > { %v671_v0 = vld [vmem:[%s1175_s25] sm:$0xf] (%p1133_p6)  ;;  %s846_s29 = sshll.u32 (%p1133_p6), %s652_s28, 2 }
 0x387   : > { %s654_s6 = scalar_lea.vmem (%p1133_p6), %s1255_s3, %s846_s29 }
 0x388   : > { %672 = vst [vmem:[%s654_s6] sm:$0xf] (%p1133_p6), %v671_v0  ;;  %676 = vst [vmem:[%s654_s6 + $0x10] sm:$0xf] (%p1133_p6), %v675_v2 }
 0x389   : > { %v677_v3 = vld [vmem:[%s1175_s25 + $0xc] sm:$0xf] }
 0x38a   : > { %v673_v1 = vld [vmem:[%s1175_s25 + $0x4] sm:$0xf]  ;;  %678 = vst [vmem:[%s654_s6 + $0x18] sm:$0xf] %v677_v3 }
 0x38b   : > { %674 = vst [vmem:[%s654_s6 + $0x8] sm:$0xf] %v673_v1 }
 0x38c PF: > { %s13_s20 = sadd.s32 1, %s1045_s20   ;;  %s1258_s12 = smov %s1017_s13 }
 0x38d   : > { %p10_p3 = scmp.ge.s32.totalorder %s13_s20, 10   ;;  %s1259_s13 = smov %s1145_s4 }
 0x38e   : > { %s1260_s14 = smov %s1033_s17  ;;  %s1261_s15 = smov %s1037_s18 }
 0x38f   : > { %s1262_s16 = smov %s1041_s19  ;;  %s1263_s17 = smov %s1267_s21 }
 0x390   : > { %s1264_s18 = smov %s1271_s22  ;;  %s1265_s19 = smov %s1275_s24 }
 0x391   :  { %12 = sbr.rel (!%p10_p3) target bundleno = 5 (0x5), region = 163 }

</bundles_post_ra>
